<compile_context>
chip_gen: v5e
topology: v5e:2x2
jax: 0.10.0
libtpu: 0.0.40
codegen_flags: <defaults>
</compile_context>

<pallas_src>
import functools

import jax
import jax.numpy as jnp
from jax.experimental import pallas as pl
from jax.experimental.pallas import tpu as pltpu


# ----------------------------------------------------------------------------
# Device VMEM query (falls back to the most conservative generation, v7x).
# ----------------------------------------------------------------------------
def _vmem_capacity_bytes():
    try:
        info = pltpu.get_tpu_info()
        for attr in ("vmem_capacity_bytes", "vmem_size_bytes", "vmem_bytes"):
            v = getattr(info, attr, None)
            if v:
                return int(v)
    except Exception:
        pass
    return 64 * 1024 * 1024  # v7x per-TC VMEM; safe lower bound everywhere


def _pick_divisor(x, candidates):
    for c in candidates:
        if c <= x and x % c == 0:
            return c
    return x


def _plan_tiles(n, k, d_out, in_bytes, out_bytes, *, force_k_tiled=False):
    """Pick kernel variant + tile sizes against the device VMEM budget."""
    vmem_cap = _vmem_capacity_bytes()
    budget = int(0.72 * vmem_cap)                       # leave compiler headroom
    vmem_limit = int(min(vmem_cap - (4 << 20), budget + (16 << 20)))

    # Largest useful row tile: power of two in [128, 1024], not wildly > n.
    tile_m_max = 128
    while tile_m_max < n and tile_m_max < 1024:
        tile_m_max *= 2

    if not force_k_tiled:
        # Resident-weight path: weight DMA'd once, kept in VMEM across all
        # row tiles.  Budget counts double-buffered X/out and (conservatively)
        # a double-buffered weight slab.
        w_res = 2 * k * d_out * in_bytes
        tm = tile_m_max
        while tm >= 128:
            total = (w_res + 2 * tm * k * in_bytes + 2 * tm * d_out * out_bytes)
            if total <= budget:
                return dict(kind="resident", tile_m=tm, vmem_limit=vmem_limit)
            tm //= 2

    # K-tiled fallback (weight too large to keep resident).
    tile_n = _pick_divisor(d_out, (512, 256, 128))
    tile_k = _pick_divisor(k, (4096, 2048, 1024, 512, 256, 128))
    tm = min(tile_m_max, 512)

    def _cost(tm_, tk_, tn_):
        return (2 * (tm_ * tk_ + tk_ * tn_) * in_bytes
                + 2 * tm_ * tn_ * out_bytes + tm_ * tn_ * 4)

    while (_cost(tm, tile_k, tile_n) > budget and tile_k > 128
           and k % (tile_k // 2) == 0):
        tile_k //= 2
    while _cost(tm, tile_k, tile_n) > budget and tm > 128:
        tm //= 2
    return dict(kind="ktiled", tile_m=tm, tile_n=tile_n, tile_k=tile_k,
                vmem_limit=vmem_limit)


# ----------------------------------------------------------------------------
# Pallas kernels
# ----------------------------------------------------------------------------
def _resident_matmul_kernel(x_ref, w_ref, o_ref):
    # Weight block has a constant index_map -> fetched once, resident in VMEM.
    o_ref[...] = jnp.dot(
        x_ref[...], w_ref[...], preferred_element_type=jnp.float32
    ).astype(o_ref.dtype)


def _ktiled_matmul_kernel(x_ref, w_ref, o_ref, acc_ref):
    @pl.when(pl.program_id(2) == 0)
    def _():
        acc_ref[...] = jnp.zeros_like(acc_ref)

    acc_ref[...] += jnp.dot(
        x_ref[...], w_ref[...], preferred_element_type=jnp.float32
    )

    @pl.when(pl.program_id(2) == pl.num_programs(2) - 1)
    def _():
        o_ref[...] = acc_ref[...].astype(o_ref.dtype)


def _merging_linear(x, w, plan, out_dtype):
    """x: (n_pad, K) compute-dtype, w: (K, d_out) compute-dtype (pre-prepared)."""
    n_pad, k = x.shape
    d_out = w.shape[1]
    in_bytes = jnp.dtype(x.dtype).itemsize
    out_bytes = jnp.dtype(out_dtype).itemsize
    tile_m = plan["tile_m"]

    if plan["kind"] == "resident":
        grid = (n_pad // tile_m,)
        cost = pl.CostEstimate(
            flops=2 * n_pad * k * d_out,
            transcendentals=0,
            bytes_accessed=(n_pad * k * in_bytes + k * d_out * in_bytes
                            + n_pad * d_out * out_bytes),
        )
        return pl.pallas_call(
            _resident_matmul_kernel,
            out_shape=jax.ShapeDtypeStruct((n_pad, d_out), out_dtype),
            grid_spec=pltpu.PrefetchScalarGridSpec(
                num_scalar_prefetch=0,
                grid=grid,
                in_specs=[
                    pl.BlockSpec((tile_m, k), lambda i: (i, 0)),
                    pl.BlockSpec((k, d_out), lambda i: (0, 0)),  # resident
                ],
                out_specs=pl.BlockSpec((tile_m, d_out), lambda i: (i, 0)),
            ),
            compiler_params=pltpu.CompilerParams(
                dimension_semantics=("parallel",),
                vmem_limit_bytes=plan["vmem_limit"],
            ),
            cost_estimate=cost,
        )(x, w)

    # K-tiled accumulator fallback for very large d (weight not VMEM-resident).
    tile_n, tile_k = plan["tile_n"], plan["tile_k"]
    grid = (n_pad // tile_m, d_out // tile_n, k // tile_k)
    cost = pl.CostEstimate(
        flops=2 * n_pad * k * d_out,
        transcendentals=0,
        bytes_accessed=(n_pad * k * in_bytes * (d_out // tile_n)   # X re-streams
                        + k * d_out * in_bytes * (n_pad // tile_m)  # W re-streams
                        + n_pad * d_out * out_bytes),
    )
    return pl.pallas_call(
        _ktiled_matmul_kernel,
        out_shape=jax.ShapeDtypeStruct((n_pad, d_out), out_dtype),
        grid_spec=pltpu.PrefetchScalarGridSpec(
            num_scalar_prefetch=0,
            grid=grid,
            in_specs=[
                pl.BlockSpec((tile_m, tile_k), lambda i, j, kk: (i, kk)),
                pl.BlockSpec((tile_k, tile_n), lambda i, j, kk: (kk, j)),
            ],
            out_specs=pl.BlockSpec((tile_m, tile_n), lambda i, j, kk: (i, j)),
            scratch_shapes=[pltpu.VMEM((tile_m, tile_n), jnp.float32)],
        ),
        compiler_params=pltpu.CompilerParams(
            dimension_semantics=("parallel", "parallel", "arbitrary"),
            vmem_limit_bytes=plan["vmem_limit"],
        ),
        cost_estimate=cost,
    )(x, w)


# ----------------------------------------------------------------------------
# One-time weight preparation (hoisted out of the per-call hot path).
# ----------------------------------------------------------------------------
def prepare_merging_weight(weight, spatial_merge_size,
                           compute_dtype=jnp.bfloat16):
    """nn.Linear weight (d_out, d*s*s) [unfold order c*s*s+ki*s+kj] ->
    (K, d_out) bf16 with K ordered (ki, kj, c) to match the cheap activation
    regroup.  Do this ONCE at model load and cache the result."""
    s = spatial_merge_size
    d_out, k_in = weight.shape
    d = k_in // (s * s)
    w = weight.reshape(d_out, d, s, s)        # [o, c, ki, kj]
    w = w.transpose(2, 3, 1, 0)               # [ki, kj, c, o]
    return w.reshape(s * s * d, d_out).astype(compute_dtype)


# ----------------------------------------------------------------------------
# PatchMerger forward (glue reshapes in JAX + Pallas matmul)
# ----------------------------------------------------------------------------
def patch_merger_forward(image_features, w_prepared, *, image_sizes,
                         spatial_merge_size, patch_size,
                         compute_dtype=jnp.bfloat16, out_dtype=None,
                         force_k_tiled=False):
    """
    image_features: (total_tokens, d)
    w_prepared:     (d*s*s, d) from prepare_merging_weight() (static param)
    image_sizes:    python list of (H_px, W_px) ints (static)
    returns:        (1, total_merged_blocks, d)
    """
    s = spatial_merge_size
    d = image_features.shape[-1]
    k_in = d * s * s
    d_out = w_prepared.shape[1]
    out_dtype = image_features.dtype if out_dtype is None else out_dtype

    grid_sizes = [(hh // patch_size, ww // patch_size) for hh, ww in image_sizes]
    n = sum((h // s) * (w // s) for h, w in grid_sizes)

    plan = _plan_tiles(n, k_in, d_out,
                       jnp.dtype(compute_dtype).itemsize,
                       jnp.dtype(out_dtype).itemsize,
                       force_k_tiled=force_k_tiled)
    tile_m = plan["tile_m"]
    n_pad = pl.cdiv(n, tile_m) * tile_m

    # Cast once up front: all regroup/concat glue then runs at bf16 width.
    flattened = image_features.reshape(-1, d).astype(compute_dtype)

    slabs = []
    offset = 0
    for h, w in grid_sizes:
        tokens = flattened[offset: offset + h * w]
        offset += h * w
        # (h*w, d) -> (h/s, s, w/s, s, d) -> (h/s, w/s, s, s, d) -> (L, s*s*d)
        # The feature axis d stays as the contiguous minor (lane) axis, so this
        # is a chunked copy rather than a lane-level transpose.  K ordering is
        # (ki, kj, c); the weight columns were permuted once to match.
        g = tokens.reshape(h // s, s, w // s, s, d).transpose(0, 2, 1, 3, 4)
        slabs.append(g.reshape((h // s) * (w // s), k_in))

    if n_pad != n:
        # Fold row padding into the concat we have to do anyway.
        slabs.append(jnp.zeros((n_pad - n, k_in), dtype=compute_dtype))
    x = slabs[0] if len(slabs) == 1 else jnp.concatenate(slabs, axis=0)

    out = _merging_linear(x, w_prepared.astype(compute_dtype), plan, out_dtype)
    if n_pad != n:
        out = out[:n]
    return out[None, :, :]                                  # (1, N_blocks, d)


if __name__ == "__main__":
    # Small synthetic config: hidden_size=32, spatial_merge_size=2, patch_size=16
    hidden_size = 32
    spatial_merge_size = 2
    patch_size = 16

    # Two images (pixels): 64x64 -> 4x4 patch grid, 32x64 -> 2x4 patch grid
    image_sizes = [(64, 64), (32, 64)]
    total_tokens = sum((hh // patch_size) * (ww // patch_size)
                       for hh, ww in image_sizes)  # 24

    key = jax.random.PRNGKey(0)
    k_feat, k_w = jax.random.split(key)
    image_features = jax.random.normal(
        k_feat, (total_tokens, hidden_size), dtype=jnp.float32)
    # nn.Linear(hidden_size * s^2 -> hidden_size, bias=False) weight: (out, in)
    merging_weight = (
        jax.random.normal(
            k_w, (hidden_size, hidden_size * spatial_merge_size ** 2),
            dtype=jnp.float32) * 0.02
    )

    # One-time (cached) weight prep -- outside the per-call hot path.
    w_prepared = prepare_merging_weight(merging_weight, spatial_merge_size)

    fwd = jax.jit(functools.partial(
        patch_merger_forward,
        image_sizes=image_sizes,
        spatial_merge_size=spatial_merge_size,
        patch_size=patch_size,
    ))
    fwd_ktiled = jax.jit(functools.partial(
        patch_merger_forward,
        image_sizes=image_sizes,
        spatial_merge_size=spatial_merge_size,
        patch_size=patch_size,
        force_k_tiled=True,
    ))

    out = jax.block_until_ready(fwd(image_features, w_prepared))
    out_kt = jax.block_until_ready(fwd_ktiled(image_features, w_prepared))

    # Pure-JAX f32 reference (same semantics as the torch module's unfold path,
    # using the ORIGINAL un-permuted weight).
    def ref(feats, sizes, w):
        s = spatial_merge_size
        d = feats.shape[-1]
        gs = [(hh // patch_size, ww // patch_size) for hh, ww in sizes]
        flat = feats.reshape(-1, d)
        rows, off = [], 0
        for h, wd in gs:
            t = flat[off: off + h * wd]; off += h * wd
            g = t.reshape(h, wd, d).transpose(2, 0, 1)
            g = g.reshape(d, h // s, s, wd // s, s).transpose(1, 3, 0, 2, 4)
            rows.append(g.reshape((h // s) * (wd // s), d * s * s))
        x = jnp.concatenate(rows, 0)
        return (x @ w.T)[None]

    expected = ref(image_features, image_sizes, merging_weight)
    assert out.shape == expected.shape == (1, 6, hidden_size)
    assert out_kt.shape == expected.shape

    # bf16 MXU inputs with f32 accumulation -> compare to f32 ref with a
    # tolerance covering bf16 rounding.
    err = float(jnp.max(jnp.abs(out - expected)))
    err_kt = float(jnp.max(jnp.abs(out_kt - expected)))
    assert jnp.allclose(out, expected, atol=2e-2, rtol=2e-2), err
    assert jnp.allclose(out_kt, expected, atol=2e-2, rtol=2e-2), err_kt

    print("KERNEL_OK")
</pallas_src>

<mosaic_0001>
module attributes {stable_mosaic.version = 11 : i64} {
  func.func @_resident_matmul_kernel(%arg0: i32, %arg1: memref<128x128xbf16, #tpu.memory_space<vmem>>, %arg2: memref<128x32xbf16, #tpu.memory_space<vmem>>, %arg3: memref<128x32xf32, #tpu.memory_space<vmem>>) attributes {dimension_semantics = [#tpu.dimension_semantics<parallel>], iteration_bounds = array<i64: 1>, scalar_prefetch = 0 : i64, scratch_operands = 0 : i64, tpu.core_type = #tpu.core_type<tc>, window_params = [{transform_indices = @transform_0, window_bounds = array<i64: 128, 128>}, {pipeline_mode = #tpu.pipeline_mode<synchronous>, transform_indices = @transform_1, window_bounds = array<i64: 128, 32>}, {transform_indices = @transform_2, window_bounds = array<i64: 128, 32>}]} {
    %c0 = arith.constant 0 : index
    %c0_0 = arith.constant 0 : index
    %0 = vector.load %arg1[%c0, %c0_0] : memref<128x128xbf16, #tpu.memory_space<vmem>>, vector<128x128xbf16>
    %c0_1 = arith.constant 0 : index
    %c0_2 = arith.constant 0 : index
    %1 = vector.load %arg2[%c0_1, %c0_2] : memref<128x32xbf16, #tpu.memory_space<vmem>>, vector<128x32xbf16>
    %cst = arith.constant dense<0.000000e+00> : vector<128x32xf32>
    %2 = tpu.matmul %0, %1, %cst {dimension_numbers = #tpu.dot_dimension_numbers<[1], [0], [0], [1], [0, 0, 1, 1], [], []>} : vector<128x128xbf16>, vector<128x32xbf16>, vector<128x32xf32> -> vector<128x32xf32>
    %c0_3 = arith.constant 0 : index
    %c0_4 = arith.constant 0 : index
    %3 = vector.load %arg3[%c0_3, %c0_4] : memref<128x32xf32, #tpu.memory_space<vmem>>, vector<128x32xf32>
    tpu.vector_store %arg3[%c0_3, %c0_4], %2 {strides = array<i32>} : memref<128x32xf32, #tpu.memory_space<vmem>>, vector<128x32xf32>,
    return
  }
  func.func @transform_0(%arg0: i32) -> (i32, i32) {
    %c0_i32 = arith.constant 0 : i32
    %c0_i32_0 = arith.constant 0 : i32
    return %arg0, %c0_i32 : i32, i32
  }
  func.func @transform_1(%arg0: i32) -> (i32, i32) {
    %c0_i32 = arith.constant 0 : i32
    %c0_i32_0 = arith.constant 0 : i32
    %c0_i32_1 = arith.constant 0 : i32
    return %c0_i32, %c0_i32_0 : i32, i32
  }
  func.func @transform_2(%arg0: i32) -> (i32, i32) {
    %c0_i32 = arith.constant 0 : i32
    %c0_i32_0 = arith.constant 0 : i32
    return %arg0, %c0_i32 : i32, i32
  }
}

</mosaic_0001>

<bundles_post_ra>
// kernel: patch_merger_forward.1
= control target key start
LH: loop header
LB: loop body
LE: loop exit
PB: predicated region body
PF: predicated region fallthrough
CT: control target
= control target key end

     0   :  { %vm188_vm0 = vcmask 261120   ;;  %s440_s1 = inlined_call_operand.vmem [shape: bf16[128,32], index: 1, kind: input, shape index: {}]   ;;  %s441_s0 = inlined_call_operand.vmem [shape: bf16[128,128], index: 0, kind: input, shape index: {}]   ;;  %s442_s2 = inlined_call_operand.vmem [shape: f32[128,32], index: 2, kind: output, shape index: {}]  }
   0x1   :  { %v288_v0 = vld [vmem:[%s440_s1 + $0x38] sm:$0xff]  ;;  %v287_v1 = vld [vmem:[%s440_s1 + $0x30] sm:$0xff]  ;;  %v286_v2 = vld [vmem:[%s440_s1 + $0x28] sm:$0xff] }
   0x2   :  { %139 = vmatpush.bf16.msra.mxu0 %v288_v0  ;;  %289 = vmatpush.bf16.msra.mxu1 %v288_v0  ;;  %v285_v3 = vld [vmem:[%s440_s1 + $0x20] sm:$0xff]  ;;  %v284_v4 = vld [vmem:[%s440_s1 + $0x18] sm:$0xff]  ;;  %v283_v5 = vld [vmem:[%s440_s1 + $0x10] sm:$0xff] }
   0x3   :  { %290 = vmatpush.bf16.msra.mxu2 %v288_v0  ;;  %291 = vmatpush.bf16.msra.mxu3 %v288_v0  ;;  %v282_v6 = vld [vmem:[%s440_s1 + $0x8] sm:$0xff]  ;;  %v281_v7 = vld [vmem:[%s440_s1] sm:$0xff]  ;;  %v275_v9 = vld [vmem:[%s441_s0 + $0x10] sm:$0xff] }
   0x4   :  { %v273_v8 = vld [vmem:[%s441_s0] sm:$0xff]  ;;  %v279_v11 = vld [vmem:[%s441_s0 + $0x30] sm:$0xff]  ;;  %v274_v12 = vld [vmem:[%s441_s0 + $0x8] sm:$0xff] }
   0x5   :  { %v277_v10 = vld [vmem:[%s441_s0 + $0x20] sm:$0xff]  ;;  %v276_v13 = vld [vmem:[%s441_s0 + $0x18] sm:$0xff]  ;;  %v278_v14 = vld [vmem:[%s441_s0 + $0x28] sm:$0xff] }
   0x6   :  { %140 = vmatpush.bf16.msra.mxu0 %v287_v1  ;;  %292 = vmatpush.bf16.msra.mxu1 %v287_v1  ;;  %v280_v15 = vld [vmem:[%s441_s0 + $0x38] sm:$0xff] }
   0x7   :  { %293 = vmatpush.bf16.msra.mxu2 %v287_v1  ;;  %294 = vmatpush.bf16.msra.mxu3 %v287_v1 }
   0xa   :  { %141 = vmatpush.bf16.msra.mxu0 %v286_v2  ;;  %295 = vmatpush.bf16.msra.mxu1 %v286_v2 }
   0xb   :  { %296 = vmatpush.bf16.msra.mxu2 %v286_v2  ;;  %297 = vmatpush.bf16.msra.mxu3 %v286_v2 }
   0xe   :  { %142 = vmatpush.bf16.msra.mxu0 %v285_v3  ;;  %298 = vmatpush.bf16.msra.mxu1 %v285_v3 }
   0xf   :  { %299 = vmatpush.bf16.msra.mxu2 %v285_v3  ;;  %300 = vmatpush.bf16.msra.mxu3 %v285_v3 }
  0x12   :  { %143 = vmatpush.bf16.msra.mxu0 %v284_v4  ;;  %301 = vmatpush.bf16.msra.mxu1 %v284_v4 }
  0x13   :  { %302 = vmatpush.bf16.msra.mxu2 %v284_v4  ;;  %303 = vmatpush.bf16.msra.mxu3 %v284_v4 }
  0x16   :  { %144 = vmatpush.bf16.msra.mxu0 %v283_v5  ;;  %304 = vmatpush.bf16.msra.mxu1 %v283_v5 }
  0x17   :  { %305 = vmatpush.bf16.msra.mxu2 %v283_v5  ;;  %306 = vmatpush.bf16.msra.mxu3 %v283_v5 }
  0x1a   :  { %145 = vmatpush.bf16.msra.mxu0 %v282_v6  ;;  %307 = vmatpush.bf16.msra.mxu1 %v282_v6 }
  0x1b   :  { %308 = vmatpush.bf16.msra.mxu2 %v282_v6  ;;  %309 = vmatpush.bf16.msra.mxu3 %v282_v6 }
  0x1e   :  { %146 = vmatpush.bf16.msra.mxu0 %v281_v7  ;;  %310 = vmatpush.bf16.msra.mxu1 %v281_v7 }
  0x1f   :  { %311 = vmatpush.bf16.msra.mxu2 %v281_v7  ;;  %312 = vmatpush.bf16.msra.mxu3 %v281_v7 }
  0x21   :  { %147 = vmatmul.bf16.vlgmr.msra.gmra.mxu0 %v273_v8  ;;  %157 = vmatmul.bf16.vlgmr.msra.gmra.mxu1 %v275_v9 }
  0x22   :  { %167 = vmatmul.bf16.vlgmr.msra.gmra.mxu2 %v277_v10  ;;  %177 = vmatmul.bf16.vlgmr.msra.gmra.mxu3 %v279_v11 }
  0x31   :  { %152 = vmatmul.bf16.gmra.mxu0 %v274_v12  ;;  %162 = vmatmul.bf16.gmra.mxu1 %v276_v13 }
  0x32   :  { %172 = vmatmul.bf16.gmra.mxu2 %v278_v14  ;;  %182 = vmatmul.bf16.gmra.mxu3 %v280_v15 }
  0x9e   :  { %v148_v16 = vpop.f32.mrf.mxu0  ;;  %v158_v17 = vpop.f32.mrf.mxu1 }
  0x9f   :  { %189 = vst.msk [vmem:[%s442_s2] sm:$0xff] %vm188_vm0, %v148_v16 }
  0xa0   :  { %193 = vst.msk [vmem:[%s442_s2 + $0x20] sm:$0xff] %vm188_vm0, %v158_v17 }
  0xa5   :  { %v168_v18 = vpop.f32.mrf.mxu2  ;;  %v178_v19 = vpop.f32.mrf.mxu3 }
  0xa6   :  { %197 = vst.msk [vmem:[%s442_s2 + $0x40] sm:$0xff] %vm188_vm0, %v168_v18  ;;  %v150_v20 = vpop.f32.mrf.mxu0  ;;  %v160_v21 = vpop.f32.mrf.mxu1 }
  0xa7   :  { %201 = vst.msk [vmem:[%s442_s2 + $0x60] sm:$0xff] %vm188_vm0, %v178_v19 }
  0xa8   :  { %190 = vst.msk [vmem:[%s442_s2 + $0x8] sm:$0xff] %vm188_vm0, %v150_v20 }
  0xa9   :  { %194 = vst.msk [vmem:[%s442_s2 + $0x28] sm:$0xff] %vm188_vm0, %v160_v21 }
  0xad   :  { %v170_v22 = vpop.f32.mrf.mxu2  ;;  %v180_v23 = vpop.f32.mrf.mxu3 }
  0xae   :  { %198 = vst.msk [vmem:[%s442_s2 + $0x48] sm:$0xff] %vm188_vm0, %v170_v22  ;;  %v153_v24 = vpop.f32.mrf.mxu0  ;;  %v163_v25 = vpop.f32.mrf.mxu1 }
  0xaf   :  { %202 = vst.msk [vmem:[%s442_s2 + $0x68] sm:$0xff] %vm188_vm0, %v180_v23 }
  0xb0   :  { %191 = vst.msk [vmem:[%s442_s2 + $0x10] sm:$0xff] %vm188_vm0, %v153_v24 }
  0xb1   :  { %195 = vst.msk [vmem:[%s442_s2 + $0x30] sm:$0xff] %vm188_vm0, %v163_v25 }
  0xb5   :  { %v173_v26 = vpop.f32.mrf.mxu2  ;;  %v183_v27 = vpop.f32.mrf.mxu3 }
  0xb6   :  { %199 = vst.msk [vmem:[%s442_s2 + $0x50] sm:$0xff] %vm188_vm0, %v173_v26  ;;  %v155_v28 = vpop.f32.mrf.mxu0  ;;  %v165_v29 = vpop.f32.mrf.mxu1 }
  0xb7   :  { %203 = vst.msk [vmem:[%s442_s2 + $0x70] sm:$0xff] %vm188_vm0, %v183_v27 }
  0xb8   :  { %192 = vst.msk [vmem:[%s442_s2 + $0x18] sm:$0xff] %vm188_vm0, %v155_v28 }
  0xb9   :  { %196 = vst.msk [vmem:[%s442_s2 + $0x38] sm:$0xff] %vm188_vm0, %v165_v29 }
  0xbd   :  { %v175_v30 = vpop.f32.mrf.mxu2  ;;  %v185_v31 = vpop.f32.mrf.mxu3 }
  0xbe   :  { %200 = vst.msk [vmem:[%s442_s2 + $0x58] sm:$0xff] %vm188_vm0, %v175_v30 }
  0xbf   :  { %204 = vst.msk [vmem:[%s442_s2 + $0x78] sm:$0xff] %vm188_vm0, %v185_v31 }

</bundles_post_ra>
